<compile_context>
chip_gen: v6e
topology: v6e:2x2x1
jax: 0.10.0
libtpu: 0.0.40
codegen_flags: <defaults>
</compile_context>

<pallas_src>
import functools
import math

import jax
import jax.numpy as jnp
from jax import lax
from jax.experimental import pallas as pl
from jax.experimental.pallas import tpu as pltpu


_TARGET_TILE_BYTES = 2 * 1024 * 1024   # ~2 MiB input tile: big enough for ~85%+ of HBM
                                        # roofline, small enough for v7x's VMEM budget.
_VMEM_LIMIT_BYTES = 32 * 1024 * 1024    # raise v5e's 16 MiB default; <= default on v6e/v7x.


def _sublane_multiple(dtype):
    """Row-tile multiple so packed sub-32-bit dtypes keep dense sublanes."""
    return max(8, 32 // jnp.dtype(dtype).itemsize)   # f32->8, bf16->16, int8/fp8->32


def _inv_norm(x, *, p, eps, axis):
    """Per-row 1/denom, denom = clamp_min(||x||_p, eps)."""
    if p == 2.0:
        ss = jnp.sum(x * x, axis=axis, keepdims=True)
        # 1/max(sqrt(ss), eps) == rsqrt(max(ss, eps^2)) (sqrt is monotone):
        # one EUP op per row instead of a broadcast divide over every element.
        return lax.rsqrt(jnp.maximum(ss, eps * eps))
    if p == 1.0:
        nrm = jnp.sum(jnp.abs(x), axis=axis, keepdims=True)
    else:
        nrm = jnp.sum(jnp.abs(x) ** p, axis=axis, keepdims=True) ** (1.0 / p)
    return 1.0 / jnp.maximum(nrm, eps)


def _normalize_lane_kernel(x_ref, o_ref, *, p, eps):
    """Rows on sublanes, normalization axis on lanes (dim == -1)."""
    x = x_ref[...].astype(jnp.float32)
    o_ref[...] = (x * _inv_norm(x, p=p, eps=eps, axis=-1)).astype(o_ref.dtype)


def _normalize_sublane_kernel(x_ref, o_ref, *, p, eps):
    """Normalization axis on sublanes (dim == -2): no wrapper-side transpose."""
    x = x_ref[...].astype(jnp.float32)
    o_ref[...] = (x * _inv_norm(x, p=p, eps=eps, axis=-2)).astype(o_ref.dtype)


def _normalize_last_dim(x, p, eps):
    orig_shape = x.shape
    orig_dtype = x.dtype
    D = orig_shape[-1]
    N = math.prod(orig_shape[:-1]) if x.ndim > 1 else 1
    x2 = x.reshape(N, D)

    itemsize = jnp.dtype(orig_dtype).itemsize
    sub = _sublane_multiple(orig_dtype)

    # Tile size by BYTES, rounded to the dtype's sublane multiple, capped at N.
    tb = max(sub, (_TARGET_TILE_BYTES // max(1, D * itemsize)) // sub * sub)
    tb = min(tb, max(sub, pl.cdiv(N, sub) * sub))
    # Keep >= 2 grid steps when possible so v7x's two TensorCores both get work.
    if pl.cdiv(N, tb) < 2 and N > sub:
        tb = max(sub, pl.cdiv(N, 2) // sub * sub)
    n_tiles = pl.cdiv(N, tb)
    # NOTE: if D < 128 (or not a multiple of 128) stores are masked vst.msk; for
    # lane-dense behaviour feed D as a multiple of 128.

    out2 = pl.pallas_call(
        functools.partial(_normalize_lane_kernel, p=p, eps=eps),
        out_shape=jax.ShapeDtypeStruct((N, D), orig_dtype),
        grid_spec=pltpu.PrefetchScalarGridSpec(
            num_scalar_prefetch=0,
            grid=(n_tiles,),
            in_specs=[pl.BlockSpec((tb, D), lambda i: (i, 0))],
            out_specs=pl.BlockSpec((tb, D), lambda i: (i, 0)),
        ),
        compiler_params=pltpu.CompilerParams(
            dimension_semantics=("parallel",),
            vmem_limit_bytes=_VMEM_LIMIT_BYTES,
        ),
        cost_estimate=pl.CostEstimate(
            flops=3 * N * D,
            transcendentals=N,
            bytes_accessed=2 * N * D * itemsize,
        ),
    )(x2)
    return out2.reshape(orig_shape)


def _normalize_dim_m2(x, p, eps):
    orig_shape = x.shape
    orig_dtype = x.dtype
    K, D = orig_shape[-2], orig_shape[-1]
    B = math.prod(orig_shape[:-2]) if x.ndim > 2 else 1
    x3 = x.reshape(B, K, D)

    itemsize = jnp.dtype(orig_dtype).itemsize
    # Lane tile by bytes; lane dim must be a multiple of 128 or the full D.
    if D % 128 != 0 or K * D * itemsize <= _TARGET_TILE_BYTES:
        td = D
    else:
        td = min(D, max(128, (_TARGET_TILE_BYTES // (K * itemsize)) // 128 * 128))
    n_lane_tiles = pl.cdiv(D, td)

    out3 = pl.pallas_call(
        functools.partial(_normalize_sublane_kernel, p=p, eps=eps),
        out_shape=jax.ShapeDtypeStruct((B, K, D), orig_dtype),
        grid_spec=pltpu.PrefetchScalarGridSpec(
            num_scalar_prefetch=0,
            grid=(B, n_lane_tiles),
            in_specs=[pl.BlockSpec((1, K, td), lambda b, j: (b, 0, j))],
            out_specs=pl.BlockSpec((1, K, td), lambda b, j: (b, 0, j)),
        ),
        compiler_params=pltpu.CompilerParams(
            dimension_semantics=("parallel", "parallel"),
            vmem_limit_bytes=_VMEM_LIMIT_BYTES,
        ),
        cost_estimate=pl.CostEstimate(
            flops=3 * B * K * D,
            transcendentals=B * D,
            bytes_accessed=2 * B * K * D * itemsize,
        ),
    )(x3)
    return out3.reshape(orig_shape)


def normalize(x, p=2.0, dim=-1, eps=1e-12):
    """Pallas equivalent of torch.nn.functional.normalize(x, p, dim, eps)."""
    p = float(p)
    eps = float(eps)
    axis = dim % x.ndim

    if x.ndim >= 2 and axis == x.ndim - 2:
        return _normalize_dim_m2(x, p, eps)

    moved = axis != x.ndim - 1
    if moved:
        # TODO(synk): arbitrary interior dims fall back to a moveaxis copy (extra HBM
        # pass each way); dim == -1 and dim == -2 (the common cases) avoid it entirely.
        x_in = jnp.moveaxis(x, axis, -1)
    else:
        x_in = x
    out = _normalize_last_dim(x_in, p, eps)
    if moved:
        out = jnp.moveaxis(out, -1, axis)
    return out


def reference_normalize(x, p=2.0, dim=-1, eps=1e-12):
    xf = x.astype(jnp.float32)
    if p == 2.0:
        nrm = jnp.sqrt(jnp.sum(xf * xf, axis=dim, keepdims=True))
    elif p == 1.0:
        nrm = jnp.sum(jnp.abs(xf), axis=dim, keepdims=True)
    else:
        nrm = jnp.sum(jnp.abs(xf) ** p, axis=dim, keepdims=True) ** (1.0 / p)
    return (xf / jnp.maximum(nrm, eps)).astype(x.dtype)


if __name__ == "__main__":
    key = jax.random.PRNGKey(0)
    k1, k2, k3, k4 = jax.random.split(key, 4)

    # Case 1: module defaults (p=2, dim=-1) on a 4-D activation.
    x_a = jax.random.normal(k1, (2, 4, 16, 16), dtype=jnp.float32)
    out_a = normalize(x_a, p=2, dim=-1, eps=1e-12)
    jax.block_until_ready(out_a)
    assert out_a.shape == x_a.shape
    assert jnp.allclose(out_a, reference_normalize(x_a), atol=1e-6, rtol=1e-5)

    # Case 2: ragged row count (15 rows, pad-free last block) + a zero row (eps clamp).
    x_b = jax.random.normal(k2, (3, 5, 48), dtype=jnp.float32)
    x_b = x_b.at[0, 0, :].set(0.0)
    out_b = normalize(x_b)
    jax.block_until_ready(out_b)
    assert jnp.allclose(out_b, reference_normalize(x_b), atol=1e-6, rtol=1e-5)

    # Case 3: dim=-2 path (sublane reduction, no wrapper-side transpose), lane-dense D.
    x_c = jax.random.normal(k3, (2, 8, 128), dtype=jnp.float32)
    out_c = normalize(x_c, dim=-2)
    jax.block_until_ready(out_c)
    assert jnp.allclose(out_c, reference_normalize(x_c, dim=-2), atol=1e-6, rtol=1e-5)

    # Case 4: bf16 input (16-row sublane multiple, f32 accumulation), lane-dense D=256.
    x_d = jax.random.normal(k4, (4, 8, 256), dtype=jnp.bfloat16)
    out_d = normalize(x_d)
    jax.block_until_ready(out_d)
    ref_d = reference_normalize(x_d)
    assert out_d.dtype == jnp.bfloat16
    assert jnp.allclose(out_d.astype(jnp.float32), ref_d.astype(jnp.float32),
                        atol=2e-2, rtol=2e-2)

    print("KERNEL_OK")
</pallas_src>

<mosaic_0001>
module attributes {stable_mosaic.version = 11 : i64} {
  func.func @_normalize_lane_kernel(%arg0: i32, %arg1: memref<64x16xf32, #tpu.memory_space<vmem>>, %arg2: memref<64x16xf32, #tpu.memory_space<vmem>>) attributes {dimension_semantics = [#tpu.dimension_semantics<parallel>], iteration_bounds = array<i64: 2>, scalar_prefetch = 0 : i64, scratch_operands = 0 : i64, tpu.core_type = #tpu.core_type<tc>, window_params = [{transform_indices = @transform_0, window_bounds = array<i64: 64, 16>}, {transform_indices = @transform_1, window_bounds = array<i64: 64, 16>}]} {
    %c0 = arith.constant 0 : index
    %c0_0 = arith.constant 0 : index
    %0 = vector.load %arg1[%c0, %c0_0] : memref<64x16xf32, #tpu.memory_space<vmem>>, vector<64x16xf32>
    %1 = arith.mulf %0, %0 : vector<64x16xf32>
    %cst = arith.constant dense<0.000000e+00> : vector<64xf32>
    %2 = vector.multi_reduction <add>, %1, %cst [1] : vector<64x16xf32> to vector<64xf32>
    %3 = vector.shape_cast %2 : vector<64xf32> to vector<64x1xf32>
    %cst_1 = arith.constant 1.000000e-24 : f32
    %4 = vector.broadcast %cst_1 : f32 to vector<64x1xf32>
    %5 = arith.maximumf %3, %4 : vector<64x1xf32>
    %6 = math.rsqrt %5 : vector<64x1xf32>
    %7 = vector.broadcast %6 : vector<64x1xf32> to vector<64x16xf32>
    %8 = arith.mulf %0, %7 : vector<64x16xf32>
    %c0_2 = arith.constant 0 : index
    %c0_3 = arith.constant 0 : index
    %9 = vector.load %arg2[%c0_2, %c0_3] : memref<64x16xf32, #tpu.memory_space<vmem>>, vector<64x16xf32>
    tpu.vector_store %arg2[%c0_2, %c0_3], %8 {strides = array<i32>} : memref<64x16xf32, #tpu.memory_space<vmem>>, vector<64x16xf32>,
    return
  }
  func.func @transform_0(%arg0: i32) -> (i32, i32) {
    %c0_i32 = arith.constant 0 : i32
    %c0_i32_0 = arith.constant 0 : i32
    return %arg0, %c0_i32 : i32, i32
  }
  func.func @transform_1(%arg0: i32) -> (i32, i32) {
    %c0_i32 = arith.constant 0 : i32
    %c0_i32_0 = arith.constant 0 : i32
    return %arg0, %c0_i32 : i32, i32
  }
}

</mosaic_0001>

<bundles_post_ra>
// kernel: tpu_custom_call.1
= control target key start
LH: loop header
LB: loop body
LE: loop exit
PB: predicated region body
PF: predicated region fallthrough
CT: control target
= control target key end

     0   :  { %s302_s6 = smov 0   ;;  %s357_s0 = inlined_call_operand.vmem [shape: f32[128,16], index: 0, kind: input, shape index: {}]   ;;  %s358_s1 = inlined_call_operand.vmem [shape: f32[128,16], index: 1, kind: output, shape index: {}]  }
   0x1 LB: > { %s249_s7 = sadd.s32 4294967295, %s290_s6   ;;  %p253_p0 = scmp.ge.s32.totalorder %s290_s6, 1  ;;  %s290_s6 = sphi %s302_s6, %s11_s6  }
   0x2   : > { %p88_p1 = scmp.lt.s32.totalorder %s290_s6, 3 }
   0x4   : > { %p89_p2 = pnand %p253_p0, %p88_p1 }
   0x5   : > { %s254_s8 = sshll.u32 (!%p89_p2), %s249_s7, 3 }
   0x6   : > { %92 = sbr.rel (%p89_p2) target bundleno = 188 (0xbc), region = 24  ;;  %p109_p3 = scmp.lt.s32.totalorder (!%p89_p2), %s254_s8, 15 }
   0xb   : > { %s360_s8 = smov (!%p109_p3, %s254_s8), 15  ;;  %vm136_vm0 = vcmask 130048  }
   0xc   : > { %s255_s9 = sshll.u32 %s360_s8, 3 }
   0xd   : > { %s112_s12 = scalar_lea.vmem %s357_s0, %s255_s9  ;;  %s118_s15 = scalar_lea.vmem %s358_s1, %s255_s9 }
   0xe   : > { %v122_v0 = vld [vmem:[%s112_s12 + $0x10] sm:$0xff]  ;;  %v120_v1 = vld [vmem:[%s112_s12] sm:$0xff]  ;;  %v318_v2 = vld [vmem:[%s112_s12 + $0x18] sm:$0xff] }
   0xf   : > { %v130_v3 = vmul.f32 %v122_v0, %v122_v0  ;;  %v128_v4 = vmul.f32 %v120_v1, %v120_v1  ;;  %v131_v5 = vmul.f32 %v318_v2, %v318_v2  ;;  %v121_v6 = vld [vmem:[%s112_s12 + $0x8] sm:$0xff]  ;;  %v324_v9 = vld [vmem:[%s112_s12 + $0x20] sm:$0xff]  ;;  %v127_v16 = vld [vmem:[%s112_s12 + $0x38] sm:$0xff] }
  0x10   : > { %v129_v7 = vmul.f32 %v121_v6, %v121_v6  ;;  %v322_v8 = vld [vmem:[%s112_s12 + $0x28] sm:$0xff]  ;;  %v132_v15 = vmul.f32 %v324_v9, %v324_v9  ;;  %v126_v17 = vld [vmem:[%s112_s12 + $0x30] sm:$0xff]  ;;  %v135_v20 = vmul.f32 %v127_v16, %v127_v16 }
  0x11   : > { %v143_v10 = vsel %vm136_vm0, %v130_v3, 0.0  ;;  %v137_v11 = vsel %vm136_vm0, %v128_v4, 0.0  ;;  %v146_v12 = vsel %vm136_vm0, %v131_v5, 0.0  ;;  %v133_v14 = vmul.f32 %v322_v8, %v322_v8 }
  0x12   : > { %144 = vadd.xlane.f32.xlu1 %v143_v10  ;;  %138 = vadd.xlane.f32.xlu0 %v137_v11  ;;  %v140_v13 = vsel %vm136_vm0, %v129_v7, 0.0  ;;  %v149_v19 = vsel %vm136_vm0, %v132_v15, 0.0  ;;  %v134_v21 = vmul.f32 %v126_v17, %v126_v17  ;;  %v158_v22 = vsel %vm136_vm0, %v135_v20, 0.0 }
  0x13   : > { %v152_v18 = vsel %vm136_vm0, %v133_v14, 0.0 }
  0x14   : > { %v155_v23 = vsel %vm136_vm0, %v134_v21, 0.0 }
  0x16   : > { %147 = vadd.xlane.f32.xlu1 %v146_v12  ;;  %141 = vadd.xlane.f32.xlu0 %v140_v13 }
  0x1a   : > { %153 = vadd.xlane.f32.xlu1 %v152_v18  ;;  %150 = vadd.xlane.f32.xlu0 %v149_v19 }
  0x1e   : > { %159 = vadd.xlane.f32.xlu1 %v158_v22  ;;  %156 = vadd.xlane.f32.xlu0 %v155_v23 }
  0x9b   : > { %v145_v24 = vpop.xlane.xlu1 %144  ;;  %v139_v25 = vpop.xlane.xlu0 %138 }
  0x9c   : > { %v163_v26 = vmax.f32 %v145_v24, 1e-24  ;;  %v161_v27 = vmax.f32 %v139_v25, 1e-24 }
  0x9e   : > { %268 = vrsqrt.f32 %v163_v26 }
  0x9f   : > { %270 = vrsqrt.f32 %v161_v27  ;;  %v148_v28 = vpop.xlane.xlu1 %147  ;;  %v142_v29 = vpop.xlane.xlu0 %141 }
  0xa0   : > { %v164_v30 = vmax.f32 %v148_v28, 1e-24  ;;  %v162_v31 = vmax.f32 %v142_v29, 1e-24 }
  0xa2   : > { %272 = vrsqrt.f32 %v164_v30 }
  0xa3   : > { %274 = vrsqrt.f32 %v162_v31  ;;  %v154_v32 = vpop.xlane.xlu1 %153  ;;  %v151_v33 = vpop.xlane.xlu0 %150 }
  0xa4   : > { %v166_v34 = vmax.f32 %v154_v32, 1e-24  ;;  %v165_v35 = vmax.f32 %v151_v33, 1e-24 }
  0xa6   : > { %276 = vrsqrt.f32 %v166_v34 }
  0xa7   : > { %278 = vrsqrt.f32 %v165_v35  ;;  %v160_v36 = vpop.xlane.xlu1 %159  ;;  %v157_v37 = vpop.xlane.xlu0 %156 }
  0xa8   : > { %v168_v38 = vmax.f32 %v160_v36, 1e-24  ;;  %v167_v39 = vmax.f32 %v157_v37, 1e-24 }
  0xaa   : > { %280 = vrsqrt.f32 %v168_v38 }
  0xab   : > { %v269_v40 = vpop.eup %268  ;;  %282 = vrsqrt.f32 %v167_v39 }
  0xac   : > { %v271_v41 = vpop.eup %270  ;;  %v179_v42 = vmul.f32 %v269_v40, %v122_v0 }
  0xad   : > { %v177_v43 = vmul.f32 %v271_v41, %v120_v1 }
  0xae   : > { %187 = vst.msk [vmem:[%s118_s15 + $0x10] sm:$0xff] %vm136_vm0, %v179_v42 }
  0xaf   : > { %v273_v44 = vpop.eup %272  ;;  %185 = vst.msk [vmem:[%s118_s15] sm:$0xff] %vm136_vm0, %v177_v43 }
  0xb0   : > { %v275_v45 = vpop.eup %274  ;;  %v180_v46 = vmul.f32 %v273_v44, %v318_v2 }
  0xb1   : > { %v178_v47 = vmul.f32 %v275_v45, %v121_v6 }
  0xb2   : > { %188 = vst.msk [vmem:[%s118_s15 + $0x18] sm:$0xff] %vm136_vm0, %v180_v46 }
  0xb3   : > { %v277_v48 = vpop.eup %276  ;;  %186 = vst.msk [vmem:[%s118_s15 + $0x8] sm:$0xff] %vm136_vm0, %v178_v47 }
  0xb4   : > { %v279_v49 = vpop.eup %278  ;;  %v182_v50 = vmul.f32 %v277_v48, %v322_v8 }
  0xb5   : > { %v181_v51 = vmul.f32 %v279_v49, %v324_v9 }
  0xb6   : > { %190 = vst.msk [vmem:[%s118_s15 + $0x28] sm:$0xff] %vm136_vm0, %v182_v50 }
  0xb7   : > { %v281_v52 = vpop.eup %280  ;;  %189 = vst.msk [vmem:[%s118_s15 + $0x20] sm:$0xff] %vm136_vm0, %v181_v51 }
  0xb8   : > { %v283_v53 = vpop.eup %282  ;;  %v184_v54 = vmul.f32 %v281_v52, %v127_v16 }
  0xb9   : > { %v183_v55 = vmul.f32 %v283_v53, %v126_v17 }
  0xba   : > { %192 = vst.msk [vmem:[%s118_s15 + $0x38] sm:$0xff] %vm136_vm0, %v184_v54 }
  0xbb   : > { %191 = vst.msk [vmem:[%s118_s15 + $0x30] sm:$0xff] %vm136_vm0, %v183_v55 }
  0xbc PF: > { %s11_s6 = sadd.s32 1, %s290_s6  }
  0xbd   : > { %p8_p4 = scmp.ge.s32.totalorder %s11_s6, 4  }
  0xbf   :  { %10 = sbr.rel (!%p8_p4) target bundleno = 1 (0x1), region = 54 }

</bundles_post_ra>
